<compile_context>
chip_gen: v7x
topology: tpu7x:2x2x1
jax: 0.10.0
libtpu: 0.0.40
codegen_flags: <defaults>
</compile_context>

<pallas_src>
import jax
import jax.numpy as jnp
from jax.experimental import pallas as pl
from jax.experimental.pallas import tpu as pltpu

input_size = 2
num_classes = 2

_SUBLANE = 8


def _round_up(x, m):
    return ((x + m - 1) // m) * m


def _linear_kernel(x_ref, w_ref, b_ref, o_ref):
    # out = x @ W_t + b ; W_t is already [D, C]. With K=N=2 the matmul is tiny; the
    # kernel is a streaming copy at HBM roofline, so keep the math exact (HIGHEST).
    o_ref[...] = (
        jnp.dot(
            x_ref[...],
            w_ref[...],
            preferred_element_type=jnp.float32,
            precision=jax.lax.Precision.HIGHEST,
        )
        + b_ref[...]
    ).astype(o_ref.dtype)
    # TODO(synk): if a sigmoid/softmax epilogue is ever added to the torch module, fuse
    # it here (jnp.exp + pl.reciprocal(approx=True)) before the store.


def logistic_regression_forward(x, weight, bias, *, batch_tile=4096, gridless_max=512):
    """x: [B, D] f32, weight: [C, D] f32 (PyTorch layout), bias: [C] f32 -> [B, C] f32."""
    B, D = x.shape
    C, Dw = weight.shape
    if Dw != D:
        raise ValueError(f"weight.shape[1]={Dw} does not match x.shape[1]={D}")
    if bias.shape != (C,):
        raise ValueError(f"bias.shape={bias.shape} does not match num_classes={C}")

    w_t = weight.T            # [D, C]   (tiny one-time transpose, done by XLA)
    b_2d = bias.reshape(1, C)  # [1, C]

    if B <= gridless_max:
        # Tiny batch: whole problem in VMEM, no grid/pipeline machinery at all.
        return pl.pallas_call(
            _linear_kernel,
            out_shape=jax.ShapeDtypeStruct((B, C), x.dtype),
            in_specs=[
                pl.BlockSpec(memory_space=pltpu.MemorySpace.VMEM),
                pl.BlockSpec(memory_space=pltpu.MemorySpace.VMEM),
                pl.BlockSpec(memory_space=pltpu.MemorySpace.VMEM),
            ],
            out_specs=pl.BlockSpec(memory_space=pltpu.MemorySpace.VMEM),
        )(x, w_t, b_2d)

    # Gridded streaming path: tile only the batch axis; partial last block is masked by
    # Pallas (no padding / slicing in the wrapper). Guarantee at least 2 grid steps so
    # v7x's two TensorCores both get work (near-zero effect on 1-TC v5e/v6e).
    tm = min(batch_tile, _round_up(pl.cdiv(B, 2), _SUBLANE))
    tm = max(tm, _SUBLANE)
    grid = (pl.cdiv(B, tm),)

    return pl.pallas_call(
        _linear_kernel,
        out_shape=jax.ShapeDtypeStruct((B, C), x.dtype),
        grid_spec=pltpu.PrefetchScalarGridSpec(
            num_scalar_prefetch=0,
            grid=grid,
            in_specs=[
                pl.BlockSpec((tm, D), lambda i: (i, 0)),  # streaming batch tile of x
                pl.BlockSpec((D, C), lambda i: (0, 0)),   # resident weight
                pl.BlockSpec((1, C), lambda i: (0, 0)),   # resident bias
            ],
            out_specs=pl.BlockSpec((tm, C), lambda i: (i, 0)),
        ),
        compiler_params=pltpu.CompilerParams(
            dimension_semantics=("parallel",),
        ),
    )(x, w_t, b_2d)


if __name__ == "__main__":
    key = jax.random.PRNGKey(0)
    kx, kw, kb, kx2 = jax.random.split(key, 4)

    # Deterministic synthetic parameters (shapes from nn.Linear(input_size, num_classes)).
    weight = jax.random.normal(kw, (num_classes, input_size), dtype=jnp.float32) * 0.1
    bias = jax.random.normal(kb, (num_classes,), dtype=jnp.float32) * 0.1

    # Small case (module-scale): exercises the gridless single-tile path.
    batch = 8
    x = jax.random.normal(kx, (batch, input_size), dtype=jnp.float32)
    out = jax.block_until_ready(logistic_regression_forward(x, weight, bias))
    ref = x @ weight.T + bias
    assert out.shape == (batch, num_classes)
    assert jnp.allclose(out, ref, atol=1e-5, rtol=1e-5)

    # Larger, non-multiple batch: exercises the >=2-step gridded path with a masked
    # partial last block and VMEM-resident weight/bias.
    big_batch = 5003
    x2 = jax.random.normal(kx2, (big_batch, input_size), dtype=jnp.float32)
    out2 = jax.block_until_ready(logistic_regression_forward(x2, weight, bias))
    ref2 = x2 @ weight.T + bias
    assert out2.shape == (big_batch, num_classes)
    assert jnp.allclose(out2, ref2, atol=1e-5, rtol=1e-5)

    print("KERNEL_OK")
</pallas_src>

<mosaic_0001>
module attributes {stable_mosaic.version = 11 : i64} {
  func.func @_linear_kernel(%arg0: memref<8x2xf32, #tpu.memory_space<vmem>>, %arg1: memref<2x2xf32, #tpu.memory_space<vmem>>, %arg2: memref<1x2xf32, #tpu.memory_space<vmem>>, %arg3: memref<8x2xf32, #tpu.memory_space<vmem>>) attributes {dimension_semantics = [], scalar_prefetch = 0 : i64, scratch_operands = 0 : i64, tpu.core_type = #tpu.core_type<tc>} {
    %c0 = arith.constant 0 : index
    %c0_0 = arith.constant 0 : index
    %0 = vector.load %arg0[%c0, %c0_0] : memref<8x2xf32, #tpu.memory_space<vmem>>, vector<8x2xf32>
    %c0_1 = arith.constant 0 : index
    %c0_2 = arith.constant 0 : index
    %1 = vector.load %arg1[%c0_1, %c0_2] : memref<2x2xf32, #tpu.memory_space<vmem>>, vector<2x2xf32>
    %cst = arith.constant dense<0.000000e+00> : vector<8x2xf32>
    %2 = tpu.matmul %0, %1, %cst {dimension_numbers = #tpu.dot_dimension_numbers<[1], [0], [0], [1], [0, 0, 1, 1], [], []>, precision = #tpu.contract_precision<fp32>} : vector<8x2xf32>, vector<2x2xf32>, vector<8x2xf32> -> vector<8x2xf32>
    %c0_3 = arith.constant 0 : index
    %c0_4 = arith.constant 0 : index
    %3 = vector.load %arg2[%c0_3, %c0_4] : memref<1x2xf32, #tpu.memory_space<vmem>>, vector<1x2xf32>
    %4 = vector.broadcast %3 : vector<1x2xf32> to vector<8x2xf32>
    %5 = arith.addf %2, %4 : vector<8x2xf32>
    %c0_5 = arith.constant 0 : index
    %c0_6 = arith.constant 0 : index
    %6 = vector.load %arg3[%c0_5, %c0_6] : memref<8x2xf32, #tpu.memory_space<vmem>>, vector<8x2xf32>
    tpu.vector_store %arg3[%c0_5, %c0_6], %5 {strides = array<i32>} : memref<8x2xf32, #tpu.memory_space<vmem>>, vector<8x2xf32>,
    return
  }
}

</mosaic_0001>

<bundles_post_ra>
// kernel: tpu_custom_call.1
= control target key start
LH: loop header
LB: loop body
LE: loop exit
PB: predicated region body
PF: predicated region fallthrough
CT: control target
= control target key end

     0   :  { %vm27_vm0 = vcmask 1041408   ;;  %vm23_vm1 = vcmask 15360   ;;  %v537_v0 = vmov 0.0   ;;  %vm538_vm2 = vmmov 0   ;;  %s579_s1 = inlined_call_operand.vmem [shape: f32[2,2], index: 1, kind: input, shape index: {}]   ;;  %s580_s0 = inlined_call_operand.vmem [shape: f32[8,2], index: 0, kind: input, shape index: {}]   ;;  %s581_s2 = inlined_call_operand.vmem [shape: f32[1,2], index: 2, kind: input, shape index: {}]   ;;  %s582_s3 = inlined_call_operand.vmem [shape: f32[8,2], index: 3, kind: output, shape index: {}]  }
   0x1   :  { %510 = vmatprep.subr.mxu0 %v537_v0  ;;  %v15_v1 = vld [vmem:[%s579_s1] sm:$0x3]  ;;  %512 = vmatprep.mubr.msk.f32.mxu0 %vm538_vm2, %v537_v0 }
   0x2   :  { %v14_v2 = vld [vmem:[%s580_s0] sm:$0xff]  ;;  %v29_v3 = vsel %vm27_vm0, %v15_v1, 0  ;;  %495 = vmatprep.subr.mxu1 %v537_v0  ;;  %497 = vmatprep.mubr.msk.f32.mxu1 %vm538_vm2, %v537_v0 }
   0x3   :  { %v25_v4 = vsel %vm23_vm1, %v14_v2, 0  ;;  %v32_v5 = vand.u32 4294901760, %v29_v3  ;;  %v482_v17 = vld [vmem:[%s581_s2] ss:$0 sm:$0xff] }
   0x4   :  { %v97_v6 = vand.u32 4294901760, %v25_v4 }
   0x5   :  { %v109_v7 = vsub.f32 %v29_v3, %v32_v5  ;;  %511 = vmatpush3.msra.mxu0 %v32_v5  ;;  %496 = vmatpush3.msra.mxu1 %v32_v5 }
   0x6   :  { %v98_v8 = vsub.f32 %v25_v4, %v97_v6  ;;  %500 = vmatprep.subr.mxu1 %v537_v0  ;;  %515 = vmatprep.subr.mxu0 %v537_v0 }
   0x7   :  { %v110_v10 = vand.u32 4294901760, %v109_v7 }
   0x8   :  { %v99_v9 = vand.u32 4294901760, %v98_v8 }
   0x9   :  { %v111_v12 = vsub.f32 %v109_v7, %v110_v10 }
   0xa   :  { %513 = vmatmul.mubr.f32.vlgmr.msra.gmra.mrb[0].mxu0 %v99_v9  ;;  %v100_v11 = vsub.f32 %v98_v8, %v99_v9 }
   0xb   :  { %516 = vmatpush3.msra.mxu0 %v110_v10  ;;  %517 = vmatprep.mubr.msk.f32.mxu0 %vm538_vm2, %v537_v0  ;;  %v112_v14 = vand.u32 4294901760, %v111_v12 }
   0xc   :  { %v101_v13 = vand.u32 4294901760, %v100_v11  ;;  %520 = vmatprep.subr.mxu0 %v537_v0 }
   0xe   :  { %498 = vmatmul.mubr.f32.vlgmr.msra.gmra.mrb[0].mxu1 %v101_v13 }
   0xf   :  { %501 = vmatpush3.msra.mxu1 %v112_v14  ;;  %502 = vmatprep.mubr.msk.f32.mxu1 %vm538_vm2, %v537_v0 }
  0x10   :  { %505 = vmatprep.subr.mxu1 %v537_v0 }
  0x12   :  { %518 = vmatmul.mubr.f32.vlgmr.msra.gmra.mrb[0].mxu0 %v97_v6 }
  0x13   :  { %521 = vmatpush3.msra.mxu0 %v32_v5  ;;  %522 = vmatprep.mubr.msk.f32.mxu0 %vm538_vm2, %v537_v0 }
  0x16   :  { %503 = vmatmul.mubr.f32.vlgmr.msra.gmra.mrb[0].mxu1 %v97_v6 }
  0x17   :  { %506 = vmatpush3.msra.mxu1 %v109_v7  ;;  %507 = vmatprep.mubr.msk.f32.mxu1 %vm538_vm2, %v537_v0 }
  0x1a   :  { %523 = vmatmul.mubr.f32.vlgmr.msra.gmra.mrb[0].mxu0 %v97_v6 }
  0x1e   :  { %508 = vmatmul.mubr.f32.vlgmr.msra.gmra.mrb[0].mxu1 %v98_v8 }
  0xed   :  { %v473_v15 = vpop.f32.mrb[0].mxu0 }
  0xee   :  { %v524_v16 = vpop.f32.mrb[1].mxu0 }
  0xf1   :  { %v253_v18 = vpop.f32.mrb[0].mxu1 }
  0xf2   :  { %v525_v19 = vadd.f32 %v482_v17, %v253_v18  ;;  %v509_v20 = vpop.f32.mrb[1].mxu1 }
  0xf4   :  { %v526_v21 = vadd.f32 %v525_v19, %v473_v15 }
  0xf6   :  { %477 = vst.msk [vmem:[%s582_s3] sm:$0xff] %vm23_vm1, %v526_v21 }

</bundles_post_ra>
